<compile_context>
chip_gen: v7x
topology: tpu7x:2x2x1
jax: 0.10.0
libtpu: 0.0.40
codegen_flags: <defaults>
</compile_context>

<pallas_src>
import jax
import jax.numpy as jnp
from jax import lax
from jax.experimental import pallas as pl
from jax.experimental.pallas import tpu as pltpu

_INV_SQRT2 = 0.7071067811865476


def _gelu_exact(y):
    # Exact (erf-based) GELU, matching nn.GELU() default. erf runs on the EUP.
    return 0.5 * y * (1.0 + lax.erf(y * _INV_SQRT2))


def _mlp_kernel_single_k(x_ref, w_ref, b_ref, o_ref):
    # Whole K in one tile: fuse matmul + bias + GELU, no scratch accumulator.
    y = lax.dot_general(
        x_ref[...], w_ref[...],
        dimension_numbers=(((1,), (1,)), ((), ())),
        preferred_element_type=jnp.float32,
    )
    y = y + b_ref[...].astype(jnp.float32)
    o_ref[...] = _gelu_exact(y).astype(o_ref.dtype)


def _mlp_kernel_multi_k(x_ref, w_ref, b_ref, o_ref, acc_ref):
    # x_ref: [tm, tk], w_ref: [tn, tk] (PyTorch layout), b_ref: [1, tn],
    # o_ref: [tm, tn], acc_ref: f32 [tm, tn] resident across the k axis.
    k = pl.program_id(2)

    @pl.when(k == 0)
    def _():
        acc_ref[...] = jnp.zeros_like(acc_ref)

    acc_ref[...] += lax.dot_general(
        x_ref[...], w_ref[...],
        dimension_numbers=(((1,), (1,)), ((), ())),
        preferred_element_type=jnp.float32,
    )

    @pl.when(k == pl.num_programs(2) - 1)
    def _():
        y = acc_ref[...] + b_ref[...].astype(jnp.float32)
        o_ref[...] = _gelu_exact(y).astype(o_ref.dtype)


def _round_up(v, m):
    return ((v + m - 1) // m) * m


def mlp_forward(x, weight, bias, *, tm=256, tn=256, tk=512):
    """Computes GELU(x @ W^T + b); dropout with p=0.0 is the identity.

    x: [..., n_in], weight: [n_out, n_in] (PyTorch layout), bias: [n_out].
    """
    # TODO(synk): non-zero dropout (training mode) would need pltpu.prng_* in-kernel.
    orig_shape = x.shape
    n_in = orig_shape[-1]
    n_out = weight.shape[0]
    x2d = x.reshape(-1, n_in)
    B = x2d.shape[0]

    # Pad to TPU-friendly, lane-dense, tile-aligned shapes. Zero-padded K columns
    # contribute 0 to the matmul (exact); padded M/N rows/cols are sliced off.
    M = _round_up(B, 8)
    N = _round_up(n_out, 128)
    K = _round_up(n_in, 128)
    tm = min(tm, M)
    tn = min(tn, N)
    tk = min(tk, K)
    M = _round_up(M, tm)
    N = _round_up(N, tn)
    K = _round_up(K, tk)

    x_p = x2d if (M, K) == (B, n_in) else jnp.pad(x2d, ((0, M - B), (0, K - n_in)))
    w_p = weight if (N, K) == (n_out, n_in) else jnp.pad(
        weight, ((0, N - n_out), (0, K - n_in)))
    b_p = (bias if N == n_out else jnp.pad(bias, (0, N - n_out))).reshape(1, N)

    nk = K // tk
    grid = (M // tm, N // tn, nk)

    flops = 2 * M * N * K
    bytes_accessed = 4 * (M * K + N * K + N + M * N)
    cost = pl.CostEstimate(
        flops=flops, transcendentals=M * N, bytes_accessed=bytes_accessed)

    if nk == 1:
        kernel = _mlp_kernel_single_k
        scratch_shapes = []
    else:
        kernel = _mlp_kernel_multi_k
        scratch_shapes = [pltpu.VMEM((tm, tn), jnp.float32)]

    out = pl.pallas_call(
        kernel,
        out_shape=jax.ShapeDtypeStruct((M, N), x.dtype),
        grid_spec=pltpu.PrefetchScalarGridSpec(
            num_scalar_prefetch=0,
            grid=grid,
            in_specs=[
                pl.BlockSpec((tm, tk), lambda i, j, k: (i, k)),   # x
                pl.BlockSpec((tn, tk), lambda i, j, k: (j, k)),   # weight [n_out, n_in]
                pl.BlockSpec((1, tn), lambda i, j, k: (0, j)),    # bias
            ],
            out_specs=pl.BlockSpec((tm, tn), lambda i, j, k: (i, j)),
            scratch_shapes=scratch_shapes,
        ),
        compiler_params=pltpu.CompilerParams(
            dimension_semantics=("parallel", "parallel", "arbitrary"),
            vmem_limit_bytes=32 * 1024 * 1024,
        ),
        cost_estimate=cost,
    )(x_p, w_p, b_p)

    out = out[:B, :n_out]
    return out.reshape(orig_shape[:-1] + (n_out,))


if __name__ == "__main__":
    # Small shapes consistent with the module: batch=8, n_in=32, n_out=16.
    B, n_in, n_out = 8, 32, 16
    key = jax.random.PRNGKey(0)
    kx, kw, kb = jax.random.split(key, 3)

    x = jax.random.normal(kx, (B, n_in), dtype=jnp.float32)
    # Deterministic init mimicking nn.Linear's uniform(-1/sqrt(n_in), 1/sqrt(n_in)).
    bound = 1.0 / (n_in ** 0.5)
    weight = jax.random.uniform(kw, (n_out, n_in), minval=-bound, maxval=bound,
                                dtype=jnp.float32)
    bias = jax.random.uniform(kb, (n_out,), minval=-bound, maxval=bound,
                              dtype=jnp.float32)

    out = mlp_forward(x, weight, bias)
    out = jax.block_until_ready(out)

    # Sanity check against a pure-JAX reference (same exact-GELU semantics).
    ref = x @ weight.T + bias
    ref = 0.5 * ref * (1.0 + lax.erf(ref * _INV_SQRT2))
    assert out.shape == (B, n_out), f"bad shape {out.shape}"
    assert jnp.allclose(out, ref, atol=1e-5, rtol=1e-5), "mismatch vs reference"

    print("KERNEL_OK")
</pallas_src>

<mosaic_0001>
module attributes {stable_mosaic.version = 11 : i64} {
  func.func @_mlp_kernel_single_k(%arg0: i32, %arg1: i32, %arg2: i32, %arg3: memref<8x128xf32, #tpu.memory_space<vmem>>, %arg4: memref<128x128xf32, #tpu.memory_space<vmem>>, %arg5: memref<1x128xf32, #tpu.memory_space<vmem>>, %arg6: memref<8x128xf32, #tpu.memory_space<vmem>>) attributes {dimension_semantics = [#tpu.dimension_semantics<parallel>, #tpu.dimension_semantics<parallel>, #tpu.dimension_semantics<arbitrary>], iteration_bounds = array<i64: 1, 1, 1>, scalar_prefetch = 0 : i64, scratch_operands = 0 : i64, tpu.core_type = #tpu.core_type<tc>, window_params = [{transform_indices = @transform_0, window_bounds = array<i64: 8, 128>}, {transform_indices = @transform_1, window_bounds = array<i64: 128, 128>}, {transform_indices = @transform_2, window_bounds = array<i64: 1, 128>}, {transform_indices = @transform_3, window_bounds = array<i64: 8, 128>}]} {
    %c0 = arith.constant 0 : index
    %c0_0 = arith.constant 0 : index
    %0 = vector.load %arg3[%c0, %c0_0] : memref<8x128xf32, #tpu.memory_space<vmem>>, vector<8x128xf32>
    %c0_1 = arith.constant 0 : index
    %c0_2 = arith.constant 0 : index
    %1 = vector.load %arg4[%c0_1, %c0_2] : memref<128x128xf32, #tpu.memory_space<vmem>>, vector<128x128xf32>
    %cst = arith.constant dense<0.000000e+00> : vector<8x128xf32>
    %2 = tpu.matmul %0, %1, %cst {dimension_numbers = #tpu.dot_dimension_numbers<[1], [1], [0], [0], [0, 0, 1, 0], [], []>} : vector<8x128xf32>, vector<128x128xf32>, vector<8x128xf32> -> vector<8x128xf32>
    %c0_3 = arith.constant 0 : index
    %c0_4 = arith.constant 0 : index
    %3 = vector.load %arg5[%c0_3, %c0_4] : memref<1x128xf32, #tpu.memory_space<vmem>>, vector<1x128xf32>
    %4 = vector.broadcast %3 : vector<1x128xf32> to vector<8x128xf32>
    %5 = arith.addf %2, %4 : vector<8x128xf32>
    %cst_5 = arith.constant 5.000000e-01 : f32
    %6 = vector.broadcast %cst_5 : f32 to vector<8x128xf32>
    %7 = arith.mulf %6, %5 : vector<8x128xf32>
    %cst_6 = arith.constant 0.707106769 : f32
    %8 = vector.broadcast %cst_6 : f32 to vector<8x128xf32>
    %9 = arith.mulf %5, %8 : vector<8x128xf32>
    %10 = math.erf %9 : vector<8x128xf32>
    %cst_7 = arith.constant 1.000000e+00 : f32
    %11 = vector.broadcast %cst_7 : f32 to vector<8x128xf32>
    %12 = arith.addf %11, %10 : vector<8x128xf32>
    %13 = arith.mulf %7, %12 : vector<8x128xf32>
    %c0_8 = arith.constant 0 : index
    %c0_9 = arith.constant 0 : index
    %14 = vector.load %arg6[%c0_8, %c0_9] : memref<8x128xf32, #tpu.memory_space<vmem>>, vector<8x128xf32>
    tpu.vector_store %arg6[%c0_8, %c0_9], %13 {strides = array<i32>} : memref<8x128xf32, #tpu.memory_space<vmem>>, vector<8x128xf32>,
    return
  }
  func.func @transform_0(%arg0: i32, %arg1: i32, %arg2: i32) -> (i32, i32) {
    %c0_i32 = arith.constant 0 : i32
    return %arg0, %arg2 : i32, i32
  }
  func.func @transform_1(%arg0: i32, %arg1: i32, %arg2: i32) -> (i32, i32) {
    %c0_i32 = arith.constant 0 : i32
    return %arg1, %arg2 : i32, i32
  }
  func.func @transform_2(%arg0: i32, %arg1: i32, %arg2: i32) -> (i32, i32) {
    %c0_i32 = arith.constant 0 : i32
    %c0_i32_0 = arith.constant 0 : i32
    return %c0_i32, %arg1 : i32, i32
  }
  func.func @transform_3(%arg0: i32, %arg1: i32, %arg2: i32) -> (i32, i32) {
    %c0_i32 = arith.constant 0 : i32
    return %arg0, %arg1 : i32, i32
  }
}

</mosaic_0001>

<bundles_post_ra>
// kernel: tpu_custom_call.1
= control target key start
LH: loop header
LB: loop body
LE: loop exit
PB: predicated region body
PF: predicated region fallthrough
CT: control target
= control target key end

     0   :  { %8 = vsyncpa [#allocation3], 0  ;;  %s390_s0 = inlined_call_operand.hbm [shape: f32[8,128], index: 0, kind: input, shape index: {}]   ;;  %s391_s1 = inlined_call_operand.hbm [shape: f32[128,128], index: 1, kind: input, shape index: {}]   ;;  %s392_s2 = inlined_call_operand.vmem [shape: f32[1,128], index: 2, kind: input, shape index: {}]   ;;  %s393_s3 = inlined_call_operand.hbm [shape: f32[8,128], index: 3, kind: output, shape index: {}]  }
   0x1   :  { %9 = vsyncpa [#allocation6], 0 }
   0x2   :  { %10 = vsyncpa [#allocation4], 0  ;;  %s316_s12 = smov [#allocation2]   ;;  %s317_s14 = smov [#allocation5]  }
   0x3   :  { %s17_s13 = sshll.u32 %s316_s12, 4  ;;  %s26_s15 = sshll.u32 %s317_s14, 4  ;;  %s18_s13 = int_to_ptr.vmem [resolvable:$true] %s17_s13  ;;  %s344_s15 = int_to_ptr.vmem [resolvable:$true] %s26_s15 }
   0x4   :  { %s244_s18 = scalar_lea.hbm %s390_s0, 128 }
   0x5   :  { %p245_p0 = scmp.ne.s32.totalorder %s390_s0, %s244_s18  ;;  %p248_p1 = scmp.lt.u32.totalorder %s244_s18, %s390_s0 }
   0x7   :  { %p250_p2 = pnand %p248_p1, %p245_p0 }
   0x9   :  { %253 = shalt.err (!%p250_p2)
}
   0xa   :  { %s254_s23 = scalar_lea.vmem %s18_s13, 128  ;;  %p259_p4 = scmp.lt.s32.totalorder %s18_s13, %s18_s13 }
   0xb   :  { %p255_p3 = scmp.ne.s32.totalorder %s18_s13, %s254_s23  ;;  %p260_p5 = scmp.lt.s32.totalorder %s254_s23, %s254_s23 }
   0xd   :  { %p261_p6 = por %p260_p5, %p259_p4 }
   0xf   :  { %p262_p7 = pnand %p261_p6, %p255_p3 }
  0x11   :  { %265 = shalt.err (!%p262_p7)
}
  0x12   :  { %20 = dma.hbm_to_vmem [thread:$0]  %s390_s0, 128, %s18_s13, [#allocation3]  }
  0x13   :  { %s266_s28 = scalar_lea.hbm %s391_s1, 2048 }
  0x14   :  { %p267_p8 = scmp.ne.s32.totalorder %s391_s1, %s266_s28  ;;  %p270_p9 = scmp.lt.u32.totalorder %s266_s28, %s391_s1 }
  0x16   :  { %p272_p10 = pnand %p270_p9, %p267_p8 }
  0x18   :  { %275 = shalt.err (!%p272_p10)
}
  0x19   :  { %s276_s6 = scalar_lea.vmem %s344_s15, 2048  ;;  %p281_p12 = scmp.lt.s32.totalorder %s344_s15, %s344_s15 }
  0x1a   :  { %p277_p11 = scmp.ne.s32.totalorder %s344_s15, %s276_s6  ;;  %p282_p13 = scmp.lt.s32.totalorder %s276_s6, %s276_s6 }
  0x1c   :  { %p283_p0 = por %p282_p13, %p281_p12 }
  0x1e   :  { %p284_p1 = pnand %p283_p0, %p277_p11 }
  0x20   :  { %287 = shalt.err (!%p284_p1)
}
  0x21   :  { %s318_s0 = smov 128   ;;  %s319_s7 = smov 8  }
  0x22   :  { %32 = dma.hbm_to_vmem [thread:$0]  %s391_s1, 2048, %s344_s15, [#allocation6], %s318_s0, %s318_s0, %s319_s7  }
  0x23   :  { %310 = dma.done.wait [#allocation3], 128  }
  0x24   :  { %311 = vsyncadd [#allocation3], 4294967168 }
  0x25   :  { %312 = dma.done.wait [#allocation6], 2048  }
  0x26   :  { %313 = vsyncadd [#allocation6], 4294965248  ;;  %v320_v0 = vmov 0.0|0.0   ;;  %vm321_vm0 = vmmov 0   ;;  %v322_v1 = vmov 0.0   ;;  %v42_v2 = vld [vmem:[#allocation5] sm:$0xff] }
  0x27   :  { %210 = vmatprep.subr.bf16.mxu0 %v320_v0  ;;  %207 = vmatprep.mubr.msk.f32.mxu0 %vm321_vm0, %v322_v1  ;;  %v43_v3 = vld [vmem:[#allocation5 + $0x8] sm:$0xff]  ;;  %v44_v5 = vld [vmem:[#allocation5 + $0x10] sm:$0xff]  ;;  %v45_v6 = vld [vmem:[#allocation5 + $0x18] sm:$0xff]  ;;  %s323_s11 = smov [#allocation7]  }
  0x28   :  { %v211_v4 = vpack.c.bf16 %v43_v3, %v42_v2  ;;  %v214_v7 = vpack.c.bf16 %v45_v6, %v44_v5  ;;  %v46_v8 = vld [vmem:[#allocation5 + $0x20] sm:$0xff]  ;;  %v47_v9 = vld [vmem:[#allocation5 + $0x28] sm:$0xff]  ;;  %v48_v11 = vld [vmem:[#allocation5 + $0x30] sm:$0xff]  ;;  %s147_s12 = sshll.u32 %s323_s11, 4  ;;  %s148_s12 = int_to_ptr.vmem [resolvable:$true] %s147_s12 }
  0x29   :  { %v217_v10 = vpack.c.bf16 %v47_v9, %v46_v8  ;;  %v49_v12 = vld [vmem:[#allocation5 + $0x38] sm:$0xff]  ;;  %v50_v14 = vld [vmem:[#allocation5 + $0x40] sm:$0xff]  ;;  %v51_v15 = vld [vmem:[#allocation5 + $0x48] sm:$0xff]  ;;  %s288_s13 = scalar_lea.vmem %s148_s12, 128  ;;  %p293_p3 = scmp.lt.s32.totalorder %s148_s12, %s148_s12 }
  0x2a   :  { %212 = vmatpush3.bf16.xpose.msra.mxu0 %v211_v4  ;;  %v220_v13 = vpack.c.bf16 %v49_v12, %v48_v11  ;;  %v223_v16 = vpack.c.bf16 %v51_v15, %v50_v14  ;;  %v52_v17 = vld [vmem:[#allocation5 + $0x50] sm:$0xff]  ;;  %v53_v18 = vld [vmem:[#allocation5 + $0x58] sm:$0xff]  ;;  %v54_v20 = vld [vmem:[#allocation5 + $0x60] sm:$0xff]  ;;  %p289_p2 = scmp.ne.s32.totalorder %s148_s12, %s288_s13  ;;  %p294_p4 = scmp.lt.s32.totalorder %s288_s13, %s288_s13 }
  0x2b   :  { %213 = vmatprep.subr.bf16.mxu0 %v320_v0  ;;  %v226_v19 = vpack.c.bf16 %v53_v18, %v52_v17  ;;  %v55_v21 = vld [vmem:[#allocation5 + $0x68] sm:$0xff]  ;;  %v56_v23 = vld [vmem:[#allocation5 + $0x70] sm:$0xff]  ;;  %v57_v24 = vld [vmem:[#allocation5 + $0x78] sm:$0xff] }
  0x2c   :  { %v229_v22 = vpack.c.bf16 %v55_v21, %v54_v20  ;;  %v232_v25 = vpack.c.bf16 %v57_v24, %v56_v23  ;;  %v41_v26 = vld [vmem:[#allocation2] sm:$0xff]  ;;  %p295_p5 = por %p294_p4, %p293_p3 }
  0x2d   :  { %v157_v27 = vld [vmem:[%s392_s2] ss:$0 sm:$0xff] }
  0x2e   :  { %p296_p6 = pnand %p295_p5, %p289_p2 }
  0x32   :  { %215 = vmatpush3.bf16.xpose.msra.mxu0 %v214_v7 }
  0x33   :  { %216 = vmatprep.subr.bf16.mxu0 %v320_v0 }
  0x3a   :  { %218 = vmatpush3.bf16.xpose.msra.mxu0 %v217_v10 }
  0x3b   :  { %219 = vmatprep.subr.bf16.mxu0 %v320_v0 }
  0x42   :  { %221 = vmatpush3.bf16.xpose.msra.mxu0 %v220_v13 }
  0x43   :  { %222 = vmatprep.subr.bf16.mxu0 %v320_v0 }
  0x4a   :  { %224 = vmatpush3.bf16.xpose.msra.mxu0 %v223_v16 }
  0x4b   :  { %225 = vmatprep.subr.bf16.mxu0 %v320_v0 }
  0x52   :  { %227 = vmatpush3.bf16.xpose.msra.mxu0 %v226_v19 }
  0x53   :  { %228 = vmatprep.subr.bf16.mxu0 %v320_v0 }
  0x5a   :  { %230 = vmatpush3.bf16.xpose.msra.mxu0 %v229_v22 }
  0x5b   :  { %231 = vmatprep.subr.bf16.mxu0 %v320_v0 }
  0x62   :  { %233 = vmatpush3.bf16.xpose.msra.mxu0 %v232_v25 }
  0x69   :  { %208 = vmatmul.mubr.f32.vlgmr.msra.gmra.mrb[0].mxu0 %v41_v26 }
 0x13c   :  { %v131_v28 = vpop.f32.mrb[0].mxu0 }
 0x13d   :  { %v132_v29 = vadd.f32 %v157_v27, %v131_v28  ;;  %v209_v30 = vpop.f32.mrb[1].mxu0 }
 0x13f   :  { %v136_v31 = vmul.f32 0.70710677, %v132_v29  ;;  %v135_v33 = vmul.f32 0.5, %v132_v29 }
 0x141   :  { %242 = verf.f32 %v136_v31 }
 0x14b   :  { %v243_v32 = vpop.eup %242 }
 0x14c   :  { %v138_v34 = vadd.f32 1.0, %v243_v32 }
 0x14e   :  { %v139_v35 = vmul.f32 %v138_v34, %v135_v33 }
 0x150   :  { %140 = vst [vmem:[#allocation7] sm:$0xff] %v139_v35 }
 0x151   :  { %299 = shalt.err (!%p296_p6)
}
 0x152   :  { %s300_s15 = scalar_lea.hbm %s393_s3, 128 }
 0x153   :  { %p301_p7 = scmp.ne.s32.totalorder %s393_s3, %s300_s15  ;;  %p304_p8 = scmp.lt.u32.totalorder %s300_s15, %s393_s3 }
 0x155   :  { %p306_p9 = pnand %p304_p8, %p301_p7 }
 0x157   :  { %309 = shalt.err (!%p306_p9)
}
 0x158   :  { %150 = dma.vmem_to_hbm [thread:$0]  %s148_s12, 128, %s393_s3, [#allocation4]  }
 0x159   :  { %314 = dma.done.wait [#allocation4], 128  }
 0x15a   :  { %315 = vsyncadd [#allocation4], 4294967168 }
 0x15b   :  { %154 = vsyncpa [#allocation3], 1 }
 0x15c   :  { %155 = vsyncpa [#allocation6], 1 }
 0x15d   :  { %156 = vsyncpa [#allocation4], 1 }

</bundles_post_ra>
